<compile_context>
chip_gen: v5e
topology: v5e:2x2
jax: 0.10.0
libtpu: 0.0.40
codegen_flags: <defaults>
</compile_context>

<pallas_src>
import functools

import jax
import jax.numpy as jnp
from jax import lax
from jax.experimental import pallas as pl
from jax.experimental.pallas import tpu as pltpu


def baseline_kernel(x_ref, w1_ref, b1_ref, w2_ref, b2_ref, o_ref):
    # Batch-on-lanes layout: x_ref [n_in, bb], o_ref [n_out, bb].
    x_t = x_ref[...]                     # [n_in, bb]
    w1 = w1_ref[...]                     # [n_hid, n_in]  (PyTorch layout)
    n_hid, n_in = w1.shape
    n_out = o_ref.shape[0]

    if n_in <= 16:
        # Tiny contraction dim: VPU broadcast-FMAs, bias as accumulator init.
        # [n_hid,1] * [1,bb] -> [n_hid,bb]; static (trace-time) unroll over n_in.
        h = b1_ref[...] + w1[:, 0:1] * x_t[0:1, :]
        for k in range(1, n_in):
            h = h + w1[:, k:k + 1] * x_t[k:k + 1, :]
    else:
        h = jnp.dot(w1, x_t, preferred_element_type=jnp.float32) + b1_ref[...]

    h = jnp.maximum(h, 0.0)              # ReLU (VPU)

    if n_out <= 8:
        # fc2 off the MXU: per-output-column VPU multiply + sublane (XLU) reduce.
        cols = []
        for j in range(n_out):
            cols.append(jnp.sum(h * w2_ref[:, j:j + 1], axis=0, keepdims=True))  # [1, bb]
        out_t = cols[0] if n_out == 1 else jnp.concatenate(cols, axis=0)
        out_t = out_t + b2_ref[...]
    else:
        # General fallback: MXU matmul contracting n_hid.
        out_t = lax.dot_general(w2_ref[...], h, (((0,), (0,)), ((), ())),
                                preferred_element_type=jnp.float32) + b2_ref[...]

    o_ref[...] = out_t.astype(o_ref.dtype)


def init_baseline_params(w1, b1, w2, b2):
    """One-time conversion from PyTorch nn.Linear layout to the kernel layout.

    w1: [n_hidden, n_input]  -> kept as-is (columns w1[:, k] broadcast over lanes)
    b1: [n_hidden]           -> [n_hidden, 1]
    w2: [n_output, n_hidden] -> [n_hidden, n_output]
    b2: [n_output]           -> [n_output, 1]
    """
    w1 = jnp.asarray(w1)
    b1 = jnp.asarray(b1).reshape(-1, 1)
    w2 = jnp.transpose(jnp.asarray(w2))
    b2 = jnp.asarray(b2).reshape(-1, 1)
    return w1, b1, w2, b2


@functools.partial(jax.jit, static_argnames=("block_b",))
def baseline_forward(x, params, *, block_b=1024):
    """x: [B, n_input]; params from init_baseline_params (already kernel-layout)."""
    w1, b1c, w2c, b2c = params
    B, n_in = x.shape
    n_hid = w1.shape[0]
    n_out = w2c.shape[1]

    # Batch-on-lanes: feed x transposed ([n_in, B]); tiny per-call copy, everything
    # inside the kernel (and its DMAs) becomes lane-dense.
    x_t = x.T

    # Batch tile selection (all Python ints; shapes are static under jit).
    lane = 128
    bb_cap = max(lane, (block_b // lane) * lane)
    if B <= lane:
        bb = B                                        # single full-array block, tiny batch
    else:
        b_lanes = -(-B // lane) * lane                # B rounded up to a lane multiple
        if b_lanes <= bb_cap:
            # Whole batch fits one cap-sized tile: split into two ~equal lane-aligned
            # steps so v7x's second TensorCore gets work (harmless on 1-TC v5e/v6e).
            bb = -(-(b_lanes // 2) // lane) * lane
        else:
            bb = bb_cap
    grid = pl.cdiv(B, bb)                             # ragged tail handled in-kernel

    out_t = pl.pallas_call(
        baseline_kernel,
        out_shape=jax.ShapeDtypeStruct((n_out, B), x.dtype),
        grid=(grid,),
        in_specs=[
            pl.BlockSpec((n_in, bb), lambda i: (0, i)),      # x_T batch tile (varies)
            pl.BlockSpec((n_hid, n_in), lambda i: (0, 0)),   # weights/biases: resident
            pl.BlockSpec((n_hid, 1), lambda i: (0, 0)),
            pl.BlockSpec((n_hid, n_out), lambda i: (0, 0)),
            pl.BlockSpec((n_out, 1), lambda i: (0, 0)),
        ],
        out_specs=pl.BlockSpec((n_out, bb), lambda i: (0, i)),
        compiler_params=pltpu.CompilerParams(
            dimension_semantics=("parallel",)),              # batch splits across TCs (v7x)
    )(x_t, w1, b1c, w2c, b2c)

    return out_t.T                                    # [B, n_out]; trivial for n_out == 1


def reference_forward(x, w1, b1, w2, b2):
    h = jnp.maximum(x @ w1.T + b1, 0.0)
    return h @ w2.T + b2


if __name__ == "__main__":
    # MountainCar sizes: state dim 2, hidden 32, scalar value output.
    n_input, n_hidden, n_output = 2, 32, 1

    key = jax.random.PRNGKey(0)
    kx, kx2, k1, k2, k3, k4 = jax.random.split(key, 6)

    # PyTorch-Linear-like init: U(-1/sqrt(fan_in), 1/sqrt(fan_in)), in PyTorch layout.
    bound1 = 1.0 / (n_input ** 0.5)
    bound2 = 1.0 / (n_hidden ** 0.5)
    w1 = jax.random.uniform(k1, (n_hidden, n_input), jnp.float32, -bound1, bound1)
    b1 = jax.random.uniform(k2, (n_hidden,), jnp.float32, -bound1, bound1)
    w2 = jax.random.uniform(k3, (n_output, n_hidden), jnp.float32, -bound2, bound2)
    b2 = jax.random.uniform(k4, (n_output,), jnp.float32, -bound2, bound2)

    # One-time layout conversion (outside the per-call hot path).
    params = init_baseline_params(w1, b1, w2, b2)

    # Small batch: single grid step, full-array block.
    x_small = jax.random.normal(kx, (8, n_input), jnp.float32)
    out_small = jax.block_until_ready(baseline_forward(x_small, params))
    ref_small = reference_forward(x_small, w1, b1, w2, b2)
    assert out_small.shape == (8, n_output)
    assert jnp.allclose(out_small, ref_small, atol=1e-5, rtol=1e-5), "mismatch (small batch)"

    # Larger ragged batch: exercises lane-dense tiles + in-kernel ragged tail (no pad/slice).
    x_big = jax.random.normal(kx2, (300, n_input), jnp.float32)
    out_big = jax.block_until_ready(baseline_forward(x_big, params))
    ref_big = reference_forward(x_big, w1, b1, w2, b2)
    assert out_big.shape == (300, n_output)
    assert jnp.allclose(out_big, ref_big, atol=1e-5, rtol=1e-5), "mismatch (tiled batch)"

    # TODO(synk): train_baseline (MSE loss + optimizer step) is training-side and not part
    # of the forward pass; not implemented as a kernel.
    print("KERNEL_OK")
</pallas_src>

<mosaic_0001>
module attributes {stable_mosaic.version = 11 : i64} {
  func.func @baseline_kernel(%arg0: i32, %arg1: memref<2x8xf32, #tpu.memory_space<vmem>>, %arg2: memref<32x2xf32, #tpu.memory_space<vmem>>, %arg3: memref<32x1xf32, #tpu.memory_space<vmem>>, %arg4: memref<32x1xf32, #tpu.memory_space<vmem>>, %arg5: memref<1x1xf32, #tpu.memory_space<vmem>>, %arg6: memref<1x8xf32, #tpu.memory_space<vmem>>) attributes {dimension_semantics = [#tpu.dimension_semantics<parallel>], iteration_bounds = array<i64: 1>, scalar_prefetch = 0 : i64, scratch_operands = 0 : i64, tpu.core_type = #tpu.core_type<tc>, window_params = [{transform_indices = @transform_0, window_bounds = array<i64: 2, 8>}, {pipeline_mode = #tpu.pipeline_mode<synchronous>, transform_indices = @transform_1, window_bounds = array<i64: 32, 2>}, {pipeline_mode = #tpu.pipeline_mode<synchronous>, transform_indices = @transform_2, window_bounds = array<i64: 32, 1>}, {pipeline_mode = #tpu.pipeline_mode<synchronous>, transform_indices = @transform_3, window_bounds = array<i64: 32, 1>}, {pipeline_mode = #tpu.pipeline_mode<synchronous>, transform_indices = @transform_4, window_bounds = array<i64: 1, 1>}, {transform_indices = @transform_5, window_bounds = array<i64: 1, 8>}]} {
    %c0 = arith.constant 0 : index
    %c0_0 = arith.constant 0 : index
    %0 = vector.load %arg1[%c0, %c0_0] : memref<2x8xf32, #tpu.memory_space<vmem>>, vector<2x8xf32>
    %c0_1 = arith.constant 0 : index
    %c0_2 = arith.constant 0 : index
    %1 = vector.load %arg2[%c0_1, %c0_2] : memref<32x2xf32, #tpu.memory_space<vmem>>, vector<32x2xf32>
    %c0_3 = arith.constant 0 : index
    %c0_4 = arith.constant 0 : index
    %2 = vector.load %arg3[%c0_3, %c0_4] : memref<32x1xf32, #tpu.memory_space<vmem>>, vector<32x1xf32>
    %3 = vector.extract_strided_slice %1 {offsets = [0, 0], sizes = [32, 1], strides = [1, 1]} : vector<32x2xf32> to vector<32x1xf32>
    %4 = vector.extract_strided_slice %0 {offsets = [0, 0], sizes = [1, 8], strides = [1, 1]} : vector<2x8xf32> to vector<1x8xf32>
    %5 = vector.broadcast %3 : vector<32x1xf32> to vector<32x8xf32>
    %6 = vector.broadcast %4 : vector<1x8xf32> to vector<32x8xf32>
    %7 = arith.mulf %5, %6 : vector<32x8xf32>
    %8 = vector.broadcast %2 : vector<32x1xf32> to vector<32x8xf32>
    %9 = arith.addf %8, %7 : vector<32x8xf32>
    %10 = vector.extract_strided_slice %1 {offsets = [0, 1], sizes = [32, 1], strides = [1, 1]} : vector<32x2xf32> to vector<32x1xf32>
    %11 = vector.extract_strided_slice %0 {offsets = [1, 0], sizes = [1, 8], strides = [1, 1]} : vector<2x8xf32> to vector<1x8xf32>
    %12 = vector.broadcast %10 : vector<32x1xf32> to vector<32x8xf32>
    %13 = vector.broadcast %11 : vector<1x8xf32> to vector<32x8xf32>
    %14 = arith.mulf %12, %13 : vector<32x8xf32>
    %15 = arith.addf %9, %14 : vector<32x8xf32>
    %cst = arith.constant 0.000000e+00 : f32
    %16 = vector.broadcast %cst : f32 to vector<32x8xf32>
    %17 = arith.maximumf %15, %16 : vector<32x8xf32>
    %c0_5 = arith.constant 0 : index
    %c0_6 = arith.constant 0 : index
    %18 = vector.load %arg4[%c0_5, %c0_6] : memref<32x1xf32, #tpu.memory_space<vmem>>, vector<32x1xf32>
    %19 = vector.broadcast %18 : vector<32x1xf32> to vector<32x8xf32>
    %20 = arith.mulf %17, %19 : vector<32x8xf32>
    %cst_7 = arith.constant dense<0.000000e+00> : vector<8xf32>
    %21 = vector.multi_reduction <add>, %20, %cst_7 [0] : vector<32x8xf32> to vector<8xf32>
    %22 = vector.shape_cast %21 : vector<8xf32> to vector<1x8xf32>
    %c0_8 = arith.constant 0 : index
    %c0_9 = arith.constant 0 : index
    %23 = vector.load %arg5[%c0_8, %c0_9] : memref<1x1xf32, #tpu.memory_space<vmem>>, vector<1x1xf32>
    %24 = vector.broadcast %23 : vector<1x1xf32> to vector<1x8xf32>
    %25 = arith.addf %22, %24 : vector<1x8xf32>
    %c0_10 = arith.constant 0 : index
    %c0_11 = arith.constant 0 : index
    %26 = vector.load %arg6[%c0_10, %c0_11] : memref<1x8xf32, #tpu.memory_space<vmem>>, vector<1x8xf32>
    tpu.vector_store %arg6[%c0_10, %c0_11], %25 {strides = array<i32>} : memref<1x8xf32, #tpu.memory_space<vmem>>, vector<1x8xf32>,
    return
  }
  func.func @transform_0(%arg0: i32) -> (i32, i32) {
    %c0_i32 = arith.constant 0 : i32
    %c0_i32_0 = arith.constant 0 : i32
    return %c0_i32, %arg0 : i32, i32
  }
  func.func @transform_1(%arg0: i32) -> (i32, i32) {
    %c0_i32 = arith.constant 0 : i32
    %c0_i32_0 = arith.constant 0 : i32
    %c0_i32_1 = arith.constant 0 : i32
    return %c0_i32, %c0_i32_0 : i32, i32
  }
  func.func @transform_2(%arg0: i32) -> (i32, i32) {
    %c0_i32 = arith.constant 0 : i32
    %c0_i32_0 = arith.constant 0 : i32
    %c0_i32_1 = arith.constant 0 : i32
    return %c0_i32, %c0_i32_0 : i32, i32
  }
  func.func @transform_3(%arg0: i32) -> (i32, i32) {
    %c0_i32 = arith.constant 0 : i32
    %c0_i32_0 = arith.constant 0 : i32
    %c0_i32_1 = arith.constant 0 : i32
    return %c0_i32, %c0_i32_0 : i32, i32
  }
  func.func @transform_4(%arg0: i32) -> (i32, i32) {
    %c0_i32 = arith.constant 0 : i32
    %c0_i32_0 = arith.constant 0 : i32
    %c0_i32_1 = arith.constant 0 : i32
    return %c0_i32, %c0_i32_0 : i32, i32
  }
  func.func @transform_5(%arg0: i32) -> (i32, i32) {
    %c0_i32 = arith.constant 0 : i32
    %c0_i32_0 = arith.constant 0 : i32
    return %c0_i32, %arg0 : i32, i32
  }
}

</mosaic_0001>

<bundles_post_ra>
// kernel: baseline_forward.1
= control target key start
LH: loop header
LB: loop body
LE: loop exit
PB: predicated region body
PF: predicated region fallthrough
CT: control target
= control target key end

     0   :  { %s292_s0 = inlined_call_operand.vmem [shape: f32[2,8], index: 0, kind: input, shape index: {}]   ;;  %s293_s1 = inlined_call_operand.vmem [shape: f32[32,2], index: 1, kind: input, shape index: {}]   ;;  %s294_s2 = inlined_call_operand.vmem [shape: f32[32,1], index: 2, kind: input, shape index: {}]   ;;  %s295_s3 = inlined_call_operand.vmem [shape: f32[32,1], index: 3, kind: input, shape index: {}]   ;;  %s296_s4 = inlined_call_operand.<no memory space> [shape: f32[1,1], index: 4, kind: input, shape index: {}]   ;;  %s297_s5 = inlined_call_operand.hbm [shape: f32[1,8], index: 5, kind: output, shape index: {}]  }
   0x1   :  { %v10_v0 = vstv %s296_s4 }
   0x2   :  { %11 = vst [vmem:[#allocation2] sm:$0x1] %v10_v0 }
   0x3   :  { %v28_v1 = vld [vmem:[%s294_s2] sm:$0xff]  ;;  %v26_v2 = vld [vmem:[%s293_s1 + $0x10] sm:$0xff]  ;;  %v214_v4 = vmov 0  }
   0x4   :  { %v24_v3 = vld [vmem:[%s293_s1] sm:$0xff]  ;;  %183 = vset.pattern.permute.xlu2 %v214_v4  ;;  %182 = vset.pattern.permute.xlu1 %v214_v4 }
   0x5   :  { %181 = vset.pattern.permute.xlu0 %v214_v4  ;;  %59 = vperm.xlu2 %183, %v28_v1  }
   0x6   :  { %44 = vperm.xlu1 %182, %v26_v2   ;;  %34 = vperm.xlu0 %181, %v24_v3  }
   0x7   :  { %12 = vsyncpa [#allocation4], 0  ;;  %v29_v5 = vld [vmem:[%s294_s2 + $0x8] sm:$0xff]  ;;  %v27_v6 = vld [vmem:[%s293_s1 + $0x18] sm:$0xff]  ;;  %v215_v9 = vmov 1   ;;  %vm138_vm0 = vcmask 64512  }
   0x8   :  { %v25_v7 = vld [vmem:[%s293_s1 + $0x8] sm:$0xff]  ;;  %v30_v8 = vld [vmem:[%s294_s2 + $0x10] sm:$0xff]  ;;  %v31_v10 = vld [vmem:[%s294_s2 + $0x18] sm:$0xff]  ;;  %s169_s20 = sshll.u32 %s297_s5, 4  ;;  %vm160_vm1 = vcmask 57344   ;;  %s170_s20 = int_to_ptr.hbm [resolvable:$true] %s169_s20 }
   0x9   :  { %v111_v11 = vld [vmem:[%s295_s3 + $0x8] sm:$0xff]  ;;  %v110_v12 = vld [vmem:[%s295_s3] sm:$0xff]  ;;  %v112_v13 = vld [vmem:[%s295_s3 + $0x10] sm:$0xff] }
   0xa   :  { %v152_v14 = vld [vmem:[#allocation2] sm:$0x1]  ;;  %v113_v15 = vld [vmem:[%s295_s3 + $0x18] sm:$0xff] }
   0xb   :  { %v23_v23 = vld [vmem:[%s292_s0] sm:$0x3]  ;;  %s216_s0 = smov [#allocation3]  }
   0xc   :  { %v52_v26 = vperm.slane %v23_v23, 0  ;;  %v97_v27 = vperm.slane %v23_v23, 1  ;;  %s167_s3 = sshll.u32 %s216_s0, 4  ;;  %s168_s3 = int_to_ptr.vmem [resolvable:$true] %s167_s3 }
   0xd   :  { %64 = vperm.xlu2 %183, %v29_v5  }
   0xe   :  { %49 = vperm.xlu1 %182, %v27_v6   ;;  %39 = vperm.xlu0 %181, %v25_v7  }
  0x15   :  { %69 = vperm.xlu2 %183, %v30_v8  }
  0x16   :  { %185 = vset.pattern.permute.xlu1 %v215_v9  ;;  %184 = vset.pattern.permute.xlu0 %v215_v9 }
  0x17   :  { %86 = vperm.xlu1 %185, %v25_v7   ;;  %82 = vperm.xlu0 %184, %v24_v3  }
  0x1d   :  { %74 = vperm.xlu2 %183, %v31_v10  }
  0x1f   :  { %90 = vperm.xlu1 %185, %v26_v2   ;;  %94 = vperm.xlu0 %184, %v27_v6  }
  0x25   :  { %121 = vperm.xlu2 %183, %v111_v11  }
  0x27   :  { %186 = vset.pattern.permute.xlu1 %v214_v4  ;;  %187 = vset.pattern.permute.xlu0 %v214_v4 }
  0x28   :  { %116 = vperm.xlu1 %186, %v110_v12   ;;  %126 = vperm.xlu0 %187, %v112_v13  }
  0x2d   :  { %155 = vperm.xlu2 %183, %v152_v14  }
  0x30   :  { %131 = vperm.xlu1 %186, %v113_v15  }
  0x5f   :  { %v60_v16 = vpop.permute.xlu2 %59 }
  0x67   :  { %v65_v19 = vpop.permute.xlu2 %64 }
  0x6f   :  { %v70_v22 = vpop.permute.xlu2 %69 }
  0x77   :  { %v75_v31 = vpop.permute.xlu2 %74 }
  0x78   :  { %v45_v17 = vpop.permute.xlu1 %44  ;;  %v35_v18 = vpop.permute.xlu0 %34 }
  0x79   :  { %v53_v29 = vmul.f32 %v52_v26, %v35_v18  ;;  %v55_v36 = vmul.f32 %v52_v26, %v45_v17 }
  0x7b   :  { %v77_v37 = vadd.f32 %v60_v16, %v53_v29  ;;  %v79_v41 = vadd.f32 %v70_v22, %v55_v36 }
  0x7f   :  { %v122_v47 = vpop.permute.xlu2 %121 }
  0x80   :  { %v50_v20 = vpop.permute.xlu1 %49  ;;  %v40_v21 = vpop.permute.xlu0 %39 }
  0x81   :  { %v54_v28 = vmul.f32 %v52_v26, %v40_v21  ;;  %v56_v42 = vmul.f32 %v52_v26, %v50_v20 }
  0x83   :  { %v78_v32 = vadd.f32 %v65_v19, %v54_v28  ;;  %v80_v49 = vadd.f32 %v75_v31, %v56_v42 }
  0x87   :  { %v156_v6 = vpop.permute.xlu2 %155 }
  0x88   :  { %v158_v8 = vperm.slane %v156_v6, 0 }
  0x89   :  { %v87_v24 = vpop.permute.xlu1 %86  ;;  %v83_v25 = vpop.permute.xlu0 %82 }
  0x8a   :  { %v99_v30 = vmul.f32 %v97_v27, %v87_v24  ;;  %v98_v33 = vmul.f32 %v97_v27, %v83_v25 }
  0x8c   :  { %v103_v38 = vadd.f32 %v99_v30, %v78_v32  ;;  %v102_v39 = vadd.f32 %v98_v33, %v77_v37 }
  0x8e   :  { %v107_v43 = vmax.f32 %v103_v38, 0.0  ;;  %v106_v46 = vmax.f32 %v102_v39, 0.0 }
  0x90   :  { %v135_v50 = vmul.f32 %v122_v47, %v107_v43 }
  0x91   :  { %v91_v34 = vpop.permute.xlu1 %90  ;;  %v95_v35 = vpop.permute.xlu0 %94 }
  0x92   :  { %v100_v40 = vmul.f32 %v97_v27, %v91_v34  ;;  %v101_v45 = vmul.f32 %v97_v27, %v95_v35  ;;  %v140_v56 = vsel %vm138_vm0, %v135_v50, 0.0 }
  0x94   :  { %v104_v44 = vadd.f32 %v100_v40, %v79_v41  ;;  %v105_v53 = vadd.f32 %v101_v45, %v80_v49 }
  0x96   :  { %v108_v55 = vmax.f32 %v104_v44, 0.0  ;;  %v109_v59 = vmax.f32 %v105_v53, 0.0 }
  0x9a   :  { %v117_v48 = vpop.permute.xlu1 %116  ;;  %v127_v52 = vpop.permute.xlu0 %126 }
  0x9b   :  { %v134_v51 = vmul.f32 %v117_v48, %v106_v46  ;;  %v136_v57 = vmul.f32 %v127_v52, %v108_v55 }
  0x9d   :  { %v139_v54 = vsel %vm138_vm0, %v134_v51, 0.0  ;;  %v142_v61 = vsel %vm138_vm0, %v136_v57, 0.0 }
  0x9e   :  { %v141_v58 = vadd.f32 %v140_v56, %v139_v54 }
  0xa0   :  { %v143_v63 = vadd.f32 %v142_v61, %v141_v58 }
  0xa2   :  { %v132_v60 = vpop.permute.xlu1 %131 }
  0xa3   :  { %v137_v62 = vmul.f32 %v132_v60, %v109_v59 }
  0xa5   :  { %v144_v0 = vsel %vm138_vm0, %v137_v62, 0.0 }
  0xa6   :  { %v145_v1 = vadd.f32 %v144_v0, %v143_v63 }
  0xa8   :  { %v146_v2 = vrot.slane %v145_v1, 4 }
  0xaa   :  { %v147_v3 = vadd.f32 %v146_v2, %v145_v1 }
  0xac   :  { %v148_v4 = vrot.slane %v147_v3, 2 }
  0xae   :  { %v149_v5 = vadd.f32 %v148_v4, %v147_v3 }
  0xb0   :  { %v150_v7 = vrot.slane %v149_v5, 1 }
  0xb2   :  { %v151_v9 = vadd.f32 %v150_v7, %v149_v5 }
  0xb4   :  { %v159_v10 = vadd.f32 %v158_v8, %v151_v9 }
  0xb6   :  { %161 = vst.msk [vmem:[#allocation3] sm:$0x1] %vm160_vm1, %v159_v10 }
  0xb7   :  { %172 = dma.vmem_to_hbm [thread:$0]  %s168_s3, 16, %s170_s20, [#allocation4]  }
  0xb8   :  { %212 = dma.done.wait [#allocation4], 16  }
  0xb9   :  { %213 = vsyncadd [#allocation4], 4294967280 }
  0xba   :  { %177 = vsyncpa [#allocation4], 1 }

</bundles_post_ra>
